<compile_context>
chip_gen: v5e
topology: v5e:2x2
jax: 0.10.0
libtpu: 0.0.40
codegen_flags: <defaults>
</compile_context>

<pallas_src>
import jax
import jax.numpy as jnp
from jax.experimental import pallas as pl
from jax.experimental.pallas import tpu as pltpu

GAMMA = 1.5            # modulating exponent (1.5 -> x * sqrt(x))
ALPHA = 0.25
LANES = 128
PAD_LOGIT = 100.0      # (logit=+100, target=1) -> focal loss exactly 0
_TILE_BYTES = 8 * 1024 * 1024        # streamed input bytes per grid step
_VMEM_LIMIT = 48 * 1024 * 1024       # < 64 MiB physical on v7x
_MIN_ROWS_FOR_MEGACORE = 2048        # don't split tiny problems across TCs


def _round_up(x, m):
    return ((x + m - 1) // m) * m


def _tensorcores_per_chip():
    """2 for megacore chips (v4 full / v5p / v7x); 1 for v5e / v6e / unknown."""
    try:
        kind = jax.devices()[0].device_kind.lower()
    except Exception:
        return 1
    if "lite" in kind or "v5e" in kind or "v6e" in kind:
        return 1
    for tag in ("v7", "v5p", "v4"):
        if tag in kind:
            return 2
    return 1


def _make_kernel(row_tile, rows_valid, needs_mask):
    """Grid = (core, k). out_ref is the (8,128) per-core partial-sum
    accumulator, resident across the k ('arbitrary') axis."""

    def kernel(pred_ref, true_ref, out_ref):
        k = pl.program_id(1)

        @pl.when(k == 0)
        def _init():
            out_ref[...] = jnp.zeros_like(out_ref)

        x = pred_ref[...].astype(jnp.float32)   # logits
        y = true_ref[...].astype(jnp.float32)   # targets in [0, 1]

        # Shared exponential: e = exp(-|x|), reused by BCE log term and sigmoid.
        e = jnp.exp(-jnp.abs(x))
        # BCEWithLogitsLoss(reduction='none'): max(x,0) - x*y + log(1+exp(-|x|))
        bce = jnp.maximum(x, 0.0) - x * y + jnp.log1p(e)

        # sigmoid(x) with one approximate (EUP) reciprocal:
        #   x >= 0: 1/(1+e),   x < 0: e/(1+e)
        inv = pl.reciprocal(1.0 + e, approx=True)
        p = jnp.where(x >= 0.0, inv, e * inv)

        # 1 - p_t == p + y - 2*p*y   (fewer VPU ops than building p_t first)
        one_minus_pt = (p + y) - 2.0 * (p * y)
        # alpha_factor == (1-ALPHA) + y*(2*ALPHA - 1)
        alpha_factor = (1.0 - ALPHA) + y * (2.0 * ALPHA - 1.0)
        # (1 - p_t) ** 1.5 == (1 - p_t) * sqrt(1 - p_t)
        modulating = one_minus_pt * jnp.sqrt(one_minus_pt)

        loss = bce * (alpha_factor * modulating)

        if needs_mask:
            # Ragged tail block: rows >= rows_valid contain garbage -> zero them.
            c = pl.program_id(0)
            gk = pl.num_programs(1)
            row0 = (c * gk + k) * row_tile
            rid = row0 + jax.lax.broadcasted_iota(jnp.int32, loss.shape, 0)
            loss = jnp.where(rid < rows_valid, loss, 0.0)

        # (row_tile, 128) -> (row_tile//8, 8, 128); sum over the leading axis is
        # pure per-vreg VPU adds.  The single cross-lane reduce is in the wrapper.
        out_ref[...] += jnp.sum(loss.reshape(-1, 8, LANES), axis=0)

    return kernel


def focal_loss(pred, true, reduction="mean"):
    """pred, true: same-shape float arrays (e.g. [B, C, H, W]); any float dtype
    (bf16 passes straight through, math is f32 in-kernel).  Returns the scalar
    focal loss, equivalent to FocalLoss(nn.BCEWithLogitsLoss(reduction=...))."""
    assert pred.shape == true.shape
    # TODO(synk): reduction='none' (elementwise output) not implemented here.
    assert reduction in ("mean", "sum")

    n = pred.size
    flat_p = pred.reshape(-1)
    flat_t = true.reshape(-1)

    # Lane alignment.  The common case (n % 128 == 0) is copy-free: the reshape
    # below is a metadata-only bitcast and the ragged row tail is masked in-kernel.
    if n % LANES:
        pad = LANES - (n % LANES)
        # TODO(synk): this concatenate still copies the whole flat array in XLA;
        # a fully copy-free ragged-lane path would need a 1-D BlockSpec.
        flat_p = jnp.concatenate(
            [flat_p, jnp.full((pad,), PAD_LOGIT, dtype=flat_p.dtype)])
        flat_t = jnp.concatenate([flat_t, jnp.ones((pad,), dtype=flat_t.dtype)])

    rows = (n + LANES - 1) // LANES          # valid 128-lane rows
    pred2d = flat_p.reshape(rows, LANES)
    true2d = flat_t.reshape(rows, LANES)

    # TensorCore split: only on megacore chips and only for non-tiny inputs.
    ncores = _tensorcores_per_chip()
    if rows < _MIN_ROWS_FOR_MEGACORE:
        ncores = 1

    # Tile: as many rows as the VMEM budget allows (bf16 inputs get ~2x rows).
    bytes_per_row = LANES * (pred2d.dtype.itemsize + true2d.dtype.itemsize)
    row_cap = max(16, (_TILE_BYTES // bytes_per_row) // 16 * 16)
    rows_per_core = -(-rows // ncores)
    row_tile = max(16, min(row_cap, _round_up(rows_per_core, 16)))
    grid_k = -(-rows_per_core // row_tile)
    needs_mask = (ncores * grid_k * row_tile) != rows

    kernel = _make_kernel(row_tile, rows, needs_mask)
    in_map = lambda c, k: (c * grid_k + k, 0)

    cost = pl.CostEstimate(
        flops=22 * rows * LANES,
        transcendentals=4 * rows * LANES,
        bytes_accessed=(pred2d.size * pred2d.dtype.itemsize
                        + true2d.size * true2d.dtype.itemsize
                        + ncores * 8 * LANES * 4),
    )

    def run(dim_sem):
        return pl.pallas_call(
            kernel,
            out_shape=jax.ShapeDtypeStruct((ncores * 8, LANES), jnp.float32),
            grid_spec=pltpu.PrefetchScalarGridSpec(
                num_scalar_prefetch=0,
                grid=(ncores, grid_k),
                in_specs=[
                    pl.BlockSpec((row_tile, LANES), in_map),
                    pl.BlockSpec((row_tile, LANES), in_map),
                ],
                out_specs=pl.BlockSpec((8, LANES), lambda c, k: (c, 0)),
            ),
            compiler_params=pltpu.CompilerParams(
                dimension_semantics=dim_sem,
                vmem_limit_bytes=_VMEM_LIMIT),
            cost_estimate=cost,
        )(pred2d, true2d)

    if ncores > 1:
        try:
            # Guarantee the 2-TensorCore split on megacore chips (v7x/v5p/v4).
            partials = run((pltpu.CORE_PARALLEL, pltpu.ARBITRARY))
        except Exception:
            partials = run(("parallel", "arbitrary"))
    else:
        partials = run(("arbitrary", "arbitrary"))

    total = jnp.sum(partials)
    if reduction == "mean":
        return total / jnp.float32(n)
    return total


def _reference(pred, true):
    """Straight transcription of the PyTorch module (reduction='mean')."""
    x = pred.astype(jnp.float32)
    y = true.astype(jnp.float32)
    bce = jnp.maximum(x, 0.0) - x * y + jnp.log1p(jnp.exp(-jnp.abs(x)))
    p = jax.nn.sigmoid(x)
    p_t = y * p + (1.0 - y) * (1.0 - p)
    af = y * ALPHA + (1.0 - y) * (1.0 - ALPHA)
    mf = (1.0 - p_t) ** GAMMA
    return jnp.mean(bce * af * mf)


if __name__ == "__main__":
    key = jax.random.PRNGKey(0)
    k1, k2 = jax.random.split(key)
    B, C, H, W = 2, 4, 16, 16
    pred = jax.random.normal(k1, (B, C, H, W), dtype=jnp.float32)
    true = (jax.random.uniform(k2, (B, C, H, W)) > 0.5).astype(jnp.float32)

    out = focal_loss(pred, true)
    jax.block_until_ready(out)

    ref = _reference(pred, true)
    # Loose rtol: the in-kernel sigmoid uses the approximate EUP reciprocal.
    assert jnp.allclose(out, ref, rtol=1e-2, atol=1e-5), (out, ref)
    print("KERNEL_OK")
</pallas_src>

<mosaic_0001>
module attributes {stable_mosaic.version = 11 : i64} {
  func.func @kernel(%arg0: i32, %arg1: i32, %arg2: memref<16x128xf32, #tpu.memory_space<vmem>>, %arg3: memref<16x128xf32, #tpu.memory_space<vmem>>, %arg4: memref<8x128xf32, #tpu.memory_space<vmem>>) attributes {dimension_semantics = [#tpu.dimension_semantics<arbitrary>, #tpu.dimension_semantics<arbitrary>], iteration_bounds = array<i64: 1, 1>, scalar_prefetch = 0 : i64, scratch_operands = 0 : i64, tpu.core_type = #tpu.core_type<tc>, window_params = [{transform_indices = @transform_0, window_bounds = array<i64: 16, 128>}, {transform_indices = @transform_1, window_bounds = array<i64: 16, 128>}, {transform_indices = @transform_2, window_bounds = array<i64: 8, 128>}]} {
    %c0_i32 = arith.constant 0 : i32
    %0 = arith.cmpi eq, %arg1, %c0_i32 : i32
    %1 = arith.extui %0 : i1 to i32
    %c0_i32_0 = arith.constant 0 : i32
    %2 = arith.cmpi ne, %1, %c0_i32_0 : i32
    scf.if %2 {
      %cst_15 = arith.constant 0.000000e+00 : f32
      %40 = vector.broadcast %cst_15 : f32 to vector<8x128xf32>
      %c0_16 = arith.constant 0 : index
      %c0_17 = arith.constant 0 : index
      %41 = vector.load %arg4[%c0_16, %c0_17] : memref<8x128xf32, #tpu.memory_space<vmem>>, vector<8x128xf32>
      tpu.vector_store %arg4[%c0_16, %c0_17], %40 {strides = array<i32>} : memref<8x128xf32, #tpu.memory_space<vmem>>, vector<8x128xf32>,
    } else {
    }
    %c0 = arith.constant 0 : index
    %c0_1 = arith.constant 0 : index
    %3 = vector.load %arg2[%c0, %c0_1] : memref<16x128xf32, #tpu.memory_space<vmem>>, vector<16x128xf32>
    %c0_2 = arith.constant 0 : index
    %c0_3 = arith.constant 0 : index
    %4 = vector.load %arg3[%c0_2, %c0_3] : memref<16x128xf32, #tpu.memory_space<vmem>>, vector<16x128xf32>
    %5 = math.absf %3 : vector<16x128xf32>
    %cst = arith.constant 0.000000e+00 : f32
    %6 = vector.broadcast %cst : f32 to vector<16x128xf32>
    %7 = arith.subf %6, %5 : vector<16x128xf32>
    %8 = math.exp %7 : vector<16x128xf32>
    %cst_4 = arith.constant 0.000000e+00 : f32
    %9 = vector.broadcast %cst_4 : f32 to vector<16x128xf32>
    %10 = arith.maximumf %3, %9 : vector<16x128xf32>
    %11 = arith.mulf %3, %4 : vector<16x128xf32>
    %12 = arith.subf %10, %11 : vector<16x128xf32>
    %13 = math.log1p %8 : vector<16x128xf32>
    %14 = arith.addf %12, %13 : vector<16x128xf32>
    %cst_5 = arith.constant 1.000000e+00 : f32
    %15 = vector.broadcast %cst_5 : f32 to vector<16x128xf32>
    %16 = arith.addf %15, %8 : vector<16x128xf32>
    %17 = tpu.reciprocal %16 {approx = true} : vector<16x128xf32> -> vector<16x128xf32>
    %cst_6 = arith.constant 0.000000e+00 : f32
    %18 = vector.broadcast %cst_6 : f32 to vector<16x128xf32>
    %19 = arith.cmpf oge, %3, %18 : vector<16x128xf32>
    %20 = arith.mulf %8, %17 : vector<16x128xf32>
    %21 = arith.select %19, %17, %20 : vector<16x128xi1>, vector<16x128xf32>
    %22 = arith.addf %21, %4 : vector<16x128xf32>
    %23 = arith.mulf %21, %4 : vector<16x128xf32>
    %cst_7 = arith.constant 2.000000e+00 : f32
    %24 = vector.broadcast %cst_7 : f32 to vector<16x128xf32>
    %25 = arith.mulf %24, %23 : vector<16x128xf32>
    %26 = arith.subf %22, %25 : vector<16x128xf32>
    %cst_8 = arith.constant -5.000000e-01 : f32
    %27 = vector.broadcast %cst_8 : f32 to vector<16x128xf32>
    %28 = arith.mulf %4, %27 : vector<16x128xf32>
    %cst_9 = arith.constant 7.500000e-01 : f32
    %29 = vector.broadcast %cst_9 : f32 to vector<16x128xf32>
    %30 = arith.addf %29, %28 : vector<16x128xf32>
    %31 = math.sqrt %26 : vector<16x128xf32>
    %32 = arith.mulf %26, %31 : vector<16x128xf32>
    %33 = arith.mulf %30, %32 : vector<16x128xf32>
    %34 = arith.mulf %14, %33 : vector<16x128xf32>
    %c0_10 = arith.constant 0 : index
    %c0_11 = arith.constant 0 : index
    %35 = vector.load %arg4[%c0_10, %c0_11] : memref<8x128xf32, #tpu.memory_space<vmem>>, vector<8x128xf32>
    %36 = vector.shape_cast %34 : vector<16x128xf32> to vector<2x8x128xf32>
    %cst_12 = arith.constant dense<0.000000e+00> : vector<8x128xf32>
    %37 = vector.multi_reduction <add>, %36, %cst_12 [0] : vector<2x8x128xf32> to vector<8x128xf32>
    %38 = arith.addf %35, %37 : vector<8x128xf32>
    %c0_13 = arith.constant 0 : index
    %c0_14 = arith.constant 0 : index
    %39 = vector.load %arg4[%c0_13, %c0_14] : memref<8x128xf32, #tpu.memory_space<vmem>>, vector<8x128xf32>
    tpu.vector_store %arg4[%c0_13, %c0_14], %38 {strides = array<i32>} : memref<8x128xf32, #tpu.memory_space<vmem>>, vector<8x128xf32>,
    return
  }
  func.func @transform_0(%arg0: i32, %arg1: i32) -> (i32, i32) {
    %c1_i32 = arith.constant 1 : i32
    %0 = arith.muli %arg0, %c1_i32 : i32
    %1 = arith.addi %0, %arg1 : i32
    %c0_i32 = arith.constant 0 : i32
    %c0_i32_0 = arith.constant 0 : i32
    return %1, %c0_i32 : i32, i32
  }
  func.func @transform_1(%arg0: i32, %arg1: i32) -> (i32, i32) {
    %c1_i32 = arith.constant 1 : i32
    %0 = arith.muli %arg0, %c1_i32 : i32
    %1 = arith.addi %0, %arg1 : i32
    %c0_i32 = arith.constant 0 : i32
    %c0_i32_0 = arith.constant 0 : i32
    return %1, %c0_i32 : i32, i32
  }
  func.func @transform_2(%arg0: i32, %arg1: i32) -> (i32, i32) {
    %c0_i32 = arith.constant 0 : i32
    %c0_i32_0 = arith.constant 0 : i32
    return %arg0, %c0_i32 : i32, i32
  }
}

</mosaic_0001>

<bundles_post_ra>
// kernel: tpu_custom_call.1
= control target key start
LH: loop header
LB: loop body
LE: loop exit
PB: predicated region body
PF: predicated region fallthrough
CT: control target
= control target key end

     0   :  { %7 = vsyncpa [#allocation3], 0  ;;  %s320_s0 = inlined_call_operand.hbm [shape: f32[16,128], index: 0, kind: input, shape index: {}]   ;;  %s321_s1 = inlined_call_operand.hbm [shape: f32[16,128], index: 1, kind: input, shape index: {}]   ;;  %s322_s2 = inlined_call_operand.hbm [shape: f32[8,128], index: 2, kind: output, shape index: {}]  }
   0x1   :  { %8 = vsyncpa [#allocation6], 0 }
   0x2   :  { %9 = vsyncpa [#allocation4], 0  ;;  %s18_s11 = sshll.u32 %s320_s0, 4  ;;  %s273_s12 = smov [#allocation2]   ;;  %s19_s11 = int_to_ptr.hbm [resolvable:$true] %s18_s11 }
   0x3   :  { %s20_s13 = sshll.u32 %s273_s12, 4  ;;  %s35_s16 = sshll.u32 %s321_s1, 4  ;;  %s21_s13 = int_to_ptr.vmem [resolvable:$true] %s20_s13  ;;  %s36_s16 = int_to_ptr.hbm [resolvable:$true] %s35_s16 }
   0x4   :  { %s274_s17 = smov 128   ;;  %s275_s18 = smov 8  }
   0x5   :  { %26 = dma.hbm_to_vmem [thread:$0]  %s19_s11, 256, %s21_s13, [#allocation3], %s274_s17, %s274_s17, %s275_s18  }
   0x6   :  { %s276_s19 = smov [#allocation5]  }
   0x7   :  { %s37_s20 = sshll.u32 %s276_s19, 4  ;;  %s38_s20 = int_to_ptr.vmem [resolvable:$true] %s37_s20 }
   0x8   :  { %43 = dma.hbm_to_vmem [thread:$0]  %s36_s16, 256, %s38_s20, [#allocation6], %s274_s17, %s274_s17, %s275_s18  }
   0x9   :  { %267 = dma.done.wait [#allocation3], 256  }
   0xa   :  { %268 = vsyncadd [#allocation3], 4294967040 }
   0xb   :  { %269 = dma.done.wait [#allocation6], 256  }
   0xc   :  { %270 = vsyncadd [#allocation6], 4294967040  ;;  %v61_v0 = vld [vmem:[#allocation2] sm:$0xff]  ;;  %v299_v1 = vld [vmem:[#allocation2 + $0x8] sm:$0xff]  ;;  %s277_s0 = smov [#allocation7]   ;;  %s162_s23 = sshll.u32 %s322_s2, 4  ;;  %s163_s23 = int_to_ptr.hbm [resolvable:$true] %s162_s23 }
   0xd   :  { %v65_v2 = vand.u32 2147483647, %v61_v0  ;;  %v66_v3 = vand.u32 2147483647, %v299_v1  ;;  %vm103_vm0 = vcmp.ge.f32.partialorder %v61_v0, 0.0  ;;  %v63_v14 = vld [vmem:[#allocation5] sm:$0xff] }
   0xe   :  { %vm104_vm1 = vcmp.ge.f32.partialorder %v299_v1, 0.0  ;;  %v64_v16 = vld [vmem:[#allocation5 + $0x8] sm:$0xff]  ;;  %v73_v34 = vmax.f32 %v61_v0, 0.0  ;;  %v75_v35 = vmul.f32 %v63_v14, %v61_v0  ;;  %v74_v44 = vmax.f32 %v299_v1, 0.0  ;;  %s160_s1 = sshll.u32 %s277_s0, 4  ;;  %s161_s1 = int_to_ptr.vmem [resolvable:$true] %s160_s1 }
   0xf   :  { %v67_v4 = vsub.f32 0.0, %v65_v2  ;;  %v68_v5 = vsub.f32 0.0, %v66_v3  ;;  %v76_v47 = vmul.f32 %v64_v16, %v299_v1  ;;  %v117_v49 = vmul.f32 -0.5, %v63_v14 }
  0x10   :  { %v77_v48 = vsub.f32 %v73_v34, %v75_v35  ;;  %v118_v53 = vmul.f32 -0.5, %v64_v16 }
  0x11   :  { %v69_v6 = vmul.f32 1.442695, %v67_v4  ;;  %v71_v7 = vmul.f32 1.442695, %v68_v5  ;;  %v78_v0 = vsub.f32 %v74_v44, %v76_v47  ;;  %v119_v4 = vadd.f32 0.75, %v117_v49 }
  0x13   :  { %179 = vpow2.f32 %v69_v6  ;;  %v120_v6 = vadd.f32 0.75, %v118_v53 }
  0x14   :  { %181 = vpow2.f32 %v71_v7 }
  0x19   :  { %v180_v8 = vpop.eup %179 }
  0x1a   :  { %v182_v9 = vpop.eup %181  ;;  %v79_v10 = vadd.f32 1.0, %v180_v8  ;;  %v82_v29 = vmul.f32 -0.5, %v180_v8  ;;  %v85_v40 = vand.u32 2147483647, %v180_v8 }
  0x1b   :  { %v88_v11 = vadd.f32 1.0, %v182_v9  ;;  %v91_v31 = vmul.f32 -0.5, %v182_v9  ;;  %v94_v45 = vand.u32 2147483647, %v182_v9 }
  0x1c   :  { %183 = vrcp.f32 %v79_v10  ;;  %v83_v37 = vadd.f32 1.0, %v82_v29  ;;  %vm305_vm2 = vcmp.lt.f32.partialorder %v85_v40, 0.0004427343 }
  0x1d   :  { %185 = vrcp.f32 %v88_v11  ;;  %v92_v41 = vadd.f32 1.0, %v91_v31  ;;  %vm309_vm3 = vcmp.lt.f32.partialorder %v94_v45, 0.0004427343 }
  0x1e   :  { %v84_v52 = vmul.f32 %v180_v8, %v83_v37 }
  0x1f   :  { %v93_v57 = vmul.f32 %v182_v9, %v92_v41 }
  0x22   :  { %v184_v12 = vpop.eup %183 }
  0x23   :  { %v186_v13 = vpop.eup %185  ;;  %v105_v15 = vmul.f32 %v184_v12, %v180_v8 }
  0x24   :  { %v106_v17 = vmul.f32 %v186_v13, %v182_v9 }
  0x25   :  { %v107_v18 = vsel %vm103_vm0, %v184_v12, %v105_v15 }
  0x26   :  { %v108_v19 = vsel %vm104_vm1, %v186_v13, %v106_v17  ;;  %v109_v20 = vadd.f32 %v107_v18, %v63_v14  ;;  %v111_v21 = vmul.f32 %v107_v18, %v63_v14 }
  0x27   :  { %v110_v22 = vadd.f32 %v108_v19, %v64_v16  ;;  %v112_v23 = vmul.f32 %v108_v19, %v64_v16 }
  0x28   :  { %v113_v24 = vmul.f32 2.0, %v111_v21 }
  0x29   :  { %v114_v25 = vmul.f32 2.0, %v112_v23 }
  0x2a   :  { %v115_v26 = vsub.f32 %v109_v20, %v113_v24 }
  0x2b   :  { %v116_v27 = vsub.f32 %v110_v22, %v114_v25 }
  0x2c   :  { %187 = vrsqrt.f32 %v115_v26  ;;  %vm128_vm4 = vcmp.eq.f32.partialorder %v115_v26, inf  ;;  %v131_v60 = vand.u32 2147483648, %v115_v26  ;;  %vm130_vm5 = vcmp.eq.f32.partialorder %v115_v26, 0.0 }
  0x2d   :  { %189 = vrsqrt.f32 %v116_v27  ;;  %vm140_vm6 = vcmp.eq.f32.partialorder %v116_v27, inf  ;;  %v143_v63 = vand.u32 2147483648, %v116_v27  ;;  %vm142_vm7 = vcmp.eq.f32.partialorder %v116_v27, 0.0 }
  0x2e   :  { %191 = vlog2.f32 %v79_v10 }
  0x2f   :  { %193 = vlog2.f32 %v88_v11 }
  0x32   :  { %v188_v28 = vpop.eup %187 }
  0x33   :  { %v190_v30 = vpop.eup %189  ;;  %v122_v32 = vmul.f32 %v188_v28, %v115_v26 }
  0x34   :  { %v134_v33 = vmul.f32 %v190_v30, %v116_v27  ;;  %v192_v39 = vpop.eup %191 }
  0x35   :  { %v123_v36 = vmul.f32 %v188_v28, %v122_v32  ;;  %v194_v43 = vpop.eup %193  ;;  %v81_v51 = vmul.f32 0.6931472, %v192_v39 }
  0x36   :  { %v135_v38 = vmul.f32 %v190_v30, %v134_v33  ;;  %v90_v56 = vmul.f32 0.6931472, %v194_v43 }
  0x37   :  { %v124_v42 = vmul.f32 0.5, %v123_v36  ;;  %v87_v1 = vsel %vm305_vm2, %v84_v52, %v81_v51 }
  0x38   :  { %v136_v46 = vmul.f32 0.5, %v135_v38  ;;  %v96_v3 = vsel %vm309_vm3, %v93_v57, %v90_v56  ;;  %v97_v9 = vadd.f32 %v87_v1, %v77_v48 }
  0x39   :  { %v125_v50 = vsub.f32 1.5, %v124_v42  ;;  %v98_v12 = vadd.f32 %v96_v3, %v78_v0 }
  0x3a   :  { %v137_v54 = vsub.f32 1.5, %v136_v46 }
  0x3b   :  { %v126_v58 = vmul.f32 %v188_v28, %v125_v50 }
  0x3c   :  { %v138_v61 = vmul.f32 %v190_v30, %v137_v54 }
  0x3d   :  { %v127_v62 = vmul.f32 %v126_v58, %v115_v26 }
  0x3e   :  { %v139_v2 = vmul.f32 %v138_v61, %v116_v27 }
  0x3f   :  { %v129_v5 = vsel %vm128_vm4, %v115_v26, %v127_v62 }
  0x40   :  { %v132_v7 = vsel %vm130_vm5, %v131_v60, %v129_v5  ;;  %v141_v8 = vsel %vm140_vm6, %v116_v27, %v139_v2 }
  0x41   :  { %v144_v10 = vsel %vm142_vm7, %v143_v63, %v141_v8  ;;  %v145_v11 = vmul.f32 %v132_v7, %v115_v26 }
  0x42   :  { %v146_v13 = vmul.f32 %v144_v10, %v116_v27 }
  0x43   :  { %v147_v14 = vmul.f32 %v145_v11, %v119_v4 }
  0x44   :  { %v148_v15 = vmul.f32 %v146_v13, %v120_v6 }
  0x45   :  { %v149_v16 = vmul.f32 %v147_v14, %v97_v9 }
  0x46   :  { %v150_v17 = vmul.f32 %v148_v15, %v98_v12 }
  0x48   :  { %v152_v18 = vadd.f32 %v150_v17, %v149_v16 }
  0x4a   :  { %154 = vst [vmem:[#allocation7] sm:$0xff] %v152_v18 }
  0x4b   :  { %165 = dma.vmem_to_hbm [thread:$0]  %s161_s1, 128, %s163_s23, [#allocation4]  }
  0x4c   :  { %271 = dma.done.wait [#allocation4], 128  }
  0x4d   :  { %272 = vsyncadd [#allocation4], 4294967168 }
  0x4e   :  { %170 = vsyncpa [#allocation3], 1 }
  0x4f   :  { %171 = vsyncpa [#allocation6], 1 }
  0x50   :  { %172 = vsyncpa [#allocation4], 1 }

</bundles_post_ra>
